<compile_context>
chip_gen: v7x
topology: tpu7x:2x2x1
jax: 0.10.0
libtpu: 0.0.40
codegen_flags: <defaults>
</compile_context>

<pallas_src>
import functools

import jax
import jax.numpy as jnp
from jax.experimental import pallas as pl
from jax.experimental.pallas import tpu as pltpu


def _mqa_kernel(x_ref, w_ref, o_ref, *, num_heads, head_dim):
    # x_ref: (Bb, S, E)   w_ref: (E, E + 2D) fused [Wq | Wk | Wv]   o_ref: (Bb, S, E)
    bb, seq_len, emb_dim = x_ref.shape
    H, D, E, S = num_heads, head_dim, emb_dim, seq_len
    dt = x_ref.dtype                      # MXU operand dtype (bf16 or f32)
    scale = 1.0 / (D ** 0.5)

    # ---- fused QKV projection: one big matmul, f32 accumulation ------------
    x2 = x_ref[...].reshape(bb * S, E)                               # leading-dim reshape
    qkv = jnp.dot(x2, w_ref[...], preferred_element_type=jnp.float32)  # (Bb*S, E+2D)
    q = (qkv[:, :E] * scale).astype(dt)      # fold 1/sqrt(D) into q once
    k = qkv[:, E:E + D].astype(dt)           # shared key   (Bb*S, D)
    v = qkv[:, E + D:E + 2 * D].astype(dt)   # shared value (Bb*S, D)

    # ---- causal mask for the head-stacked (H*S, S) score slab --------------
    # Row i = h*S + s corresponds to query position s; mask is s >= key_pos.
    row_s = jax.lax.broadcasted_iota(jnp.int32, (S, S), 0)
    col_s = jax.lax.broadcasted_iota(jnp.int32, (S, S), 1)
    qpos = jnp.concatenate([row_s] * H, axis=0)                      # (H*S, S)
    kpos = jnp.concatenate([col_s] * H, axis=0)
    causal = qpos >= kpos
    # -inf is safe: the causal diagonal guarantees >= 1 unmasked entry / row.
    neg_inf = jnp.float32(-jnp.inf)

    # Contract on head_dim directly (no explicit k transpose).
    dimnums = (((1,), (1,)), ((), ()))

    outs = []
    for b in range(bb):                       # static, small batch block
        lo = b * S
        q_b = q[lo:lo + S, :]                 # (S, E)
        k_b = k[lo:lo + S, :]                 # (S, D)
        v_b = v[lo:lo + S, :]                 # (S, D)

        # Merge ALL heads once: (S, E) -> (H*S, D) (head-major row stacking).
        q_m = jnp.concatenate([q_b[:, h * D:(h + 1) * D] for h in range(H)],
                              axis=0)                                # (H*S, D)

        # One scores matmul for every head.
        scores = jax.lax.dot_general(q_m, k_b, dimnums,
                                     preferred_element_type=jnp.float32)  # (H*S, S)
        scores = jnp.where(causal, scores, neg_inf)

        # One numerically-stable softmax over the whole slab (f32 math).
        m = jnp.max(scores, axis=-1, keepdims=True)
        e = jnp.exp(scores - m)
        ssum = jnp.sum(e, axis=-1, keepdims=True)
        p = (e * pl.reciprocal(ssum, approx=True)).astype(dt)

        # One PV matmul for every head.
        out_m = jnp.dot(p, v_b, preferred_element_type=jnp.float32)  # (H*S, D)

        # Un-merge heads: (H*S, D) -> (S, H*D) == (S, E); head h lands in
        # columns [h*D, (h+1)*D), matching out.transpose(1,2).view(B,S,H*D).
        out_se = jnp.concatenate([out_m[h * S:(h + 1) * S, :] for h in range(H)],
                                 axis=1)
        outs.append(out_se)

    # Single whole-block store (lane-dense whenever E is a multiple of 128).
    o_ref[...] = jnp.stack(outs, axis=0).astype(o_ref.dtype)


def _vmem_capacity_bytes():
    """Per-core VMEM capacity; conservative default if the query fails."""
    try:
        info = pltpu.get_tpu_info()
        cap = getattr(info, "vmem_capacity_bytes", None)
        if cap:
            return int(cap)
    except Exception:
        pass
    return 64 << 20  # v7x per-TensorCore VMEM (smallest of v5e/v6e/v7x)


def _working_set_bytes(bb, S, E, D, H, in_item, out_item, w_single_buffered):
    """Rough per-grid-step VMEM working set (incl. double buffering)."""
    f32 = 4
    tiles = 2 * bb * S * E * in_item          # input tile, double-buffered
    tiles += 2 * bb * S * E * out_item        # output tile, double-buffered
    w = E * (E + 2 * D) * in_item             # fused QKV weight
    tiles += w if w_single_buffered else 2 * w
    inter = bb * S * (E + 2 * D) * (f32 + in_item)                  # qkv f32 + casts
    inter += bb * (2 * H * S * S * f32 + 2 * H * S * D * f32 + S * E * f32)
    return tiles + inter


def multi_query_attention(x, wq_t, wk_t, wv_t, *, num_heads, block_b=None):
    """x: (B, S, E); wq_t: (E, E); wk_t, wv_t: (E, D). Returns (B, S, E)."""
    B, S, E = x.shape
    H = num_heads
    D = E // H
    assert wq_t.shape == (E, E) and wk_t.shape == (E, D) and wv_t.shape == (E, D)

    # Fuse the three projections into one weight: x is streamed through the
    # MXU once and only one weight block is DMA'd.
    w_qkv = jnp.concatenate([wq_t, wk_t, wv_t], axis=1)              # (E, E + 2D)

    in_item = jnp.dtype(x.dtype).itemsize
    cap = _vmem_capacity_bytes()

    if block_b is None:
        budget = int(0.4 * cap)
        max_bb = max(1, B // 2)   # keep >= 2 parallel grid steps (v7x: 2 TCs)
        block_b = 1
        for d in range(1, max_bb + 1):
            if B % d == 0 and _working_set_bytes(
                    d, S, E, D, H, in_item, in_item, True) <= budget:
                block_b = d
    assert B % block_b == 0

    est = _working_set_bytes(block_b, S, E, D, H, in_item, in_item, True)
    vmem_limit = int(min(cap // 2, max(32 << 20, 2 * est)))

    kernel = functools.partial(_mqa_kernel, num_heads=H, head_dim=D)

    def build(weight_buffer_count):
        w_kwargs = ({"pipeline_mode": pl.Buffered(weight_buffer_count)}
                    if weight_buffer_count is not None else {})
        return pl.pallas_call(
            kernel,
            out_shape=jax.ShapeDtypeStruct((B, S, E), x.dtype),
            grid_spec=pltpu.PrefetchScalarGridSpec(
                num_scalar_prefetch=0,
                grid=(B // block_b,),
                in_specs=[
                    pl.BlockSpec((block_b, S, E), lambda b: (b, 0, 0)),
                    # Constant index_map -> weight never changes across steps.
                    pl.BlockSpec((E, E + 2 * D), lambda b: (0, 0), **w_kwargs),
                ],
                out_specs=pl.BlockSpec((block_b, S, E), lambda b: (b, 0, 0)),
            ),
            compiler_params=pltpu.CompilerParams(
                dimension_semantics=("parallel",),
                vmem_limit_bytes=vmem_limit),
        )

    try:
        # Single-buffer the constant weight block (halves its VMEM footprint).
        return jax.block_until_ready(build(1)(x, w_qkv))
    except Exception:
        # Fallback if this JAX build rejects pipeline_mode=Buffered(1).
        return jax.block_until_ready(build(None)(x, w_qkv))


def _reference_mqa(x, wq_t, wk_t, wv_t, num_heads):
    """Pure-JAX (f32) reference mirroring the PyTorch forward."""
    x = x.astype(jnp.float32)
    wq_t = wq_t.astype(jnp.float32)
    wk_t = wk_t.astype(jnp.float32)
    wv_t = wv_t.astype(jnp.float32)
    B, S, E = x.shape
    D = E // num_heads
    k = x @ wk_t                                                  # (B, S, D)
    q = x @ wq_t                                                  # (B, S, E)
    v = x @ wv_t                                                  # (B, S, D)
    q = q.reshape(B, S, num_heads, D).transpose(0, 2, 1, 3)       # (B, H, S, D)
    kq = jnp.einsum("bhqd,bkd->bhqk", q, k) / (D ** 0.5)
    mask = jnp.tril(jnp.ones((S, S), dtype=bool))
    kq = jnp.where(mask[None, None], kq, -jnp.inf)
    p = jax.nn.softmax(kq, axis=-1)
    out = jnp.einsum("bhqk,bkd->bhqd", p, v)                      # (B, H, S, D)
    return out.transpose(0, 2, 1, 3).reshape(B, S, E)


if __name__ == "__main__":
    # Config: emb_dim=32, num_heads=4 -> head_dim=8. Input (B=2, S=8, E=32).
    num_heads = 4
    emb_dim = 32
    head_dim = emb_dim // num_heads
    B, S = 2, 8

    key = jax.random.PRNGKey(0)
    kx, kq, kk, kv = jax.random.split(key, 4)

    x = jax.random.normal(kx, (B, S, emb_dim), dtype=jnp.float32)
    # PyTorch nn.Linear weight is (out, in); we store the transposed (in, out).
    wq_t = jax.random.normal(kq, (emb_dim, emb_dim), dtype=jnp.float32) * 0.1
    wk_t = jax.random.normal(kk, (emb_dim, head_dim), dtype=jnp.float32) * 0.1
    wv_t = jax.random.normal(kv, (emb_dim, head_dim), dtype=jnp.float32) * 0.1

    # f32 operands (tolerance accounts for the approx EUP reciprocal in softmax).
    out = multi_query_attention(x, wq_t, wk_t, wv_t, num_heads=num_heads)
    out = jax.block_until_ready(out)
    ref = _reference_mqa(x, wq_t, wk_t, wv_t, num_heads)
    assert out.shape == (B, S, emb_dim)
    err = jnp.max(jnp.abs(out - ref))
    assert jnp.allclose(out, ref, atol=2e-3, rtol=2e-3), f"f32 max err {err}"

    # bf16 MXU operands with f32 accumulation (the recommended default path).
    xb = x.astype(jnp.bfloat16)
    wqb = wq_t.astype(jnp.bfloat16)
    wkb = wk_t.astype(jnp.bfloat16)
    wvb = wv_t.astype(jnp.bfloat16)
    out_bf16 = multi_query_attention(xb, wqb, wkb, wvb, num_heads=num_heads)
    out_bf16 = jax.block_until_ready(out_bf16).astype(jnp.float32)
    ref_bf16 = _reference_mqa(xb, wqb, wkb, wvb, num_heads)
    err_b = jnp.max(jnp.abs(out_bf16 - ref_bf16))
    assert jnp.allclose(out_bf16, ref_bf16, atol=5e-2, rtol=5e-2), (
        f"bf16 max err {err_b}")

    print("KERNEL_OK")
</pallas_src>

<mosaic_0001>
module attributes {stable_mosaic.version = 11 : i64} {
  func.func @_mqa_kernel(%arg0: i32, %arg1: memref<1x8x32xf32, #tpu.memory_space<vmem>>, %arg2: memref<32x48xf32, #tpu.memory_space<vmem>>, %arg3: memref<1x8x32xf32, #tpu.memory_space<vmem>>) attributes {dimension_semantics = [#tpu.dimension_semantics<parallel>], iteration_bounds = array<i64: 2>, scalar_prefetch = 0 : i64, scratch_operands = 0 : i64, tpu.core_type = #tpu.core_type<tc>, window_params = [{transform_indices = @transform_0, window_bounds = array<i64: 1, 8, 32>}, {pipeline_mode = #tpu.pipeline_mode<synchronous>, transform_indices = @transform_1, window_bounds = array<i64: 32, 48>}, {transform_indices = @transform_2, window_bounds = array<i64: 1, 8, 32>}]} {
    %c0 = arith.constant 0 : index
    %c0_0 = arith.constant 0 : index
    %c0_1 = arith.constant 0 : index
    %0 = vector.load %arg1[%c0, %c0_0, %c0_1] : memref<1x8x32xf32, #tpu.memory_space<vmem>>, vector<1x8x32xf32>
    %1 = vector.shape_cast %0 : vector<1x8x32xf32> to vector<8x32xf32>
    %c0_2 = arith.constant 0 : index
    %c0_3 = arith.constant 0 : index
    %2 = vector.load %arg2[%c0_2, %c0_3] : memref<32x48xf32, #tpu.memory_space<vmem>>, vector<32x48xf32>
    %cst = arith.constant dense<0.000000e+00> : vector<8x48xf32>
    %3 = tpu.matmul %1, %2, %cst {dimension_numbers = #tpu.dot_dimension_numbers<[1], [0], [0], [1], [0, 0, 1, 1], [], []>} : vector<8x32xf32>, vector<32x48xf32>, vector<8x48xf32> -> vector<8x48xf32>
    %4 = vector.extract_strided_slice %3 {offsets = [0, 0], sizes = [8, 32], strides = [1, 1]} : vector<8x48xf32> to vector<8x32xf32>
    %cst_4 = arith.constant 0.353553385 : f32
    %5 = vector.broadcast %cst_4 : f32 to vector<8x32xf32>
    %6 = arith.mulf %4, %5 : vector<8x32xf32>
    %7 = vector.extract_strided_slice %3 {offsets = [0, 32], sizes = [8, 8], strides = [1, 1]} : vector<8x48xf32> to vector<8x8xf32>
    %8 = vector.extract_strided_slice %3 {offsets = [0, 40], sizes = [8, 8], strides = [1, 1]} : vector<8x48xf32> to vector<8x8xf32>
    %9 = tpu.iota {dimensions = array<i32: 0>} : vector<8x8xi32>
    %10 = tpu.iota {dimensions = array<i32: 1>} : vector<8x8xi32>
    %11 = tpu.concatenate %9, %9, %9, %9 in 0 : vector<8x8xi32>, vector<8x8xi32>, vector<8x8xi32>, vector<8x8xi32> -> vector<32x8xi32>
    %12 = tpu.concatenate %10, %10, %10, %10 in 0 : vector<8x8xi32>, vector<8x8xi32>, vector<8x8xi32>, vector<8x8xi32> -> vector<32x8xi32>
    %13 = arith.cmpi sge, %11, %12 : vector<32x8xi32>
    %14 = vector.extract_strided_slice %6 {offsets = [0, 0], sizes = [8, 8], strides = [1, 1]} : vector<8x32xf32> to vector<8x8xf32>
    %15 = vector.extract_strided_slice %6 {offsets = [0, 8], sizes = [8, 8], strides = [1, 1]} : vector<8x32xf32> to vector<8x8xf32>
    %16 = vector.extract_strided_slice %6 {offsets = [0, 16], sizes = [8, 8], strides = [1, 1]} : vector<8x32xf32> to vector<8x8xf32>
    %17 = vector.extract_strided_slice %6 {offsets = [0, 24], sizes = [8, 8], strides = [1, 1]} : vector<8x32xf32> to vector<8x8xf32>
    %18 = tpu.concatenate %14, %15, %16, %17 in 0 : vector<8x8xf32>, vector<8x8xf32>, vector<8x8xf32>, vector<8x8xf32> -> vector<32x8xf32>
    %cst_5 = arith.constant dense<0.000000e+00> : vector<32x8xf32>
    %19 = tpu.matmul %18, %7, %cst_5 {dimension_numbers = #tpu.dot_dimension_numbers<[1], [1], [0], [0], [0, 0, 1, 0], [], []>} : vector<32x8xf32>, vector<8x8xf32>, vector<32x8xf32> -> vector<32x8xf32>
    %cst_6 = arith.constant 0xFF800000 : f32
    %20 = vector.broadcast %cst_6 : f32 to vector<32x8xf32>
    %21 = arith.select %13, %19, %20 : vector<32x8xi1>, vector<32x8xf32>
    %cst_7 = arith.constant dense<0xFF800000> : vector<32xf32>
    %22 = vector.multi_reduction <maximumf>, %21, %cst_7 [1] : vector<32x8xf32> to vector<32xf32>
    %23 = vector.shape_cast %22 : vector<32xf32> to vector<32x1xf32>
    %24 = vector.broadcast %23 : vector<32x1xf32> to vector<32x8xf32>
    %25 = arith.subf %21, %24 : vector<32x8xf32>
    %26 = math.exp %25 : vector<32x8xf32>
    %cst_8 = arith.constant dense<0.000000e+00> : vector<32xf32>
    %27 = vector.multi_reduction <add>, %26, %cst_8 [1] : vector<32x8xf32> to vector<32xf32>
    %28 = vector.shape_cast %27 : vector<32xf32> to vector<32x1xf32>
    %29 = tpu.reciprocal %28 {approx = true} : vector<32x1xf32> -> vector<32x1xf32>
    %30 = vector.broadcast %29 : vector<32x1xf32> to vector<32x8xf32>
    %31 = arith.mulf %26, %30 : vector<32x8xf32>
    %cst_9 = arith.constant dense<0.000000e+00> : vector<32x8xf32>
    %32 = tpu.matmul %31, %8, %cst_9 {dimension_numbers = #tpu.dot_dimension_numbers<[1], [0], [0], [1], [0, 0, 1, 1], [], []>} : vector<32x8xf32>, vector<8x8xf32>, vector<32x8xf32> -> vector<32x8xf32>
    %33 = vector.extract_strided_slice %32 {offsets = [0, 0], sizes = [8, 8], strides = [1, 1]} : vector<32x8xf32> to vector<8x8xf32>
    %34 = vector.extract_strided_slice %32 {offsets = [8, 0], sizes = [8, 8], strides = [1, 1]} : vector<32x8xf32> to vector<8x8xf32>
    %35 = vector.extract_strided_slice %32 {offsets = [16, 0], sizes = [8, 8], strides = [1, 1]} : vector<32x8xf32> to vector<8x8xf32>
    %36 = vector.extract_strided_slice %32 {offsets = [24, 0], sizes = [8, 8], strides = [1, 1]} : vector<32x8xf32> to vector<8x8xf32>
    %37 = tpu.concatenate %33, %34, %35, %36 in 1 : vector<8x8xf32>, vector<8x8xf32>, vector<8x8xf32>, vector<8x8xf32> -> vector<8x32xf32>
    %38 = vector.shape_cast %37 : vector<8x32xf32> to vector<1x8x32xf32>
    %c0_10 = arith.constant 0 : index
    %c0_11 = arith.constant 0 : index
    %c0_12 = arith.constant 0 : index
    %39 = vector.load %arg3[%c0_10, %c0_11, %c0_12] : memref<1x8x32xf32, #tpu.memory_space<vmem>>, vector<1x8x32xf32>
    tpu.vector_store %arg3[%c0_10, %c0_11, %c0_12], %38 {strides = array<i32>} : memref<1x8x32xf32, #tpu.memory_space<vmem>>, vector<1x8x32xf32>,
    return
  }
  func.func @transform_0(%arg0: i32) -> (i32, i32, i32) {
    %c0_i32 = arith.constant 0 : i32
    %c0_i32_0 = arith.constant 0 : i32
    %c0_i32_1 = arith.constant 0 : i32
    return %arg0, %c0_i32, %c0_i32_0 : i32, i32, i32
  }
  func.func @transform_1(%arg0: i32) -> (i32, i32) {
    %c0_i32 = arith.constant 0 : i32
    %c0_i32_0 = arith.constant 0 : i32
    %c0_i32_1 = arith.constant 0 : i32
    return %c0_i32, %c0_i32_0 : i32, i32
  }
  func.func @transform_2(%arg0: i32) -> (i32, i32, i32) {
    %c0_i32 = arith.constant 0 : i32
    %c0_i32_0 = arith.constant 0 : i32
    %c0_i32_1 = arith.constant 0 : i32
    return %arg0, %c0_i32, %c0_i32_0 : i32, i32, i32
  }
}

module attributes {stable_mosaic.version = 11 : i64} {
  func.func @_mqa_kernel(%arg0: i32, %arg1: memref<1x8x32xf32, #tpu.memory_space<vmem>>, %arg2: memref<32x48xf32, #tpu.memory_space<vmem>>, %arg3: memref<1x8x32xf32, #tpu.memory_space<vmem>>) attributes {dimension_semantics = [#tpu.dimension_semantics<parallel>], iteration_bounds = array<i64: 2>, scalar_prefetch = 0 : i64, scratch_operands = 0 : i64, tpu.core_type = #tpu.core_type<tc>, window_params = [{transform_indices = @transform_0, window_bounds = array<i64: 1, 8, 32>}, {pipeline_mode = #tpu.pipeline_mode<synchronous>, transform_indices = @transform_1, window_bounds = array<i64: 32, 48>}, {transform_indices = @transform_2, window_bounds = array<i64: 1, 8, 32>}]} {
    %c0 = arith.constant 0 : index
    %c0_0 = arith.constant 0 : index
    %c0_1 = arith.constant 0 : index
    %0 = vector.load %arg1[%c0, %c0_0, %c0_1] : memref<1x8x32xf32, #tpu.memory_space<vmem>>, vector<1x8x32xf32>
    %1 = vector.shape_cast %0 : vector<1x8x32xf32> to vector<8x32xf32>
    %c0_2 = arith.constant 0 : index
    %c0_3 = arith.constant 0 : index
    %2 = vector.load %arg2[%c0_2, %c0_3] : memref<32x48xf32, #tpu.memory_space<vmem>>, vector<32x48xf32>
    %cst = arith.constant dense<0.000000e+00> : vector<8x48xf32>
    %3 = tpu.matmul %1, %2, %cst {dimension_numbers = #tpu.dot_dimension_numbers<[1], [0], [0], [1], [0, 0, 1, 1], [], []>} : vector<8x32xf32>, vector<32x48xf32>, vector<8x48xf32> -> vector<8x48xf32>
    %4 = vector.extract_strided_slice %3 {offsets = [0, 0], sizes = [8, 32], strides = [1, 1]} : vector<8x48xf32> to vector<8x32xf32>
    %cst_4 = arith.constant 0.353553385 : f32
    %5 = vector.broadcast %cst_4 : f32 to vector<8x32xf32>
    %6 = arith.mulf %4, %5 : vector<8x32xf32>
    %7 = vector.extract_strided_slice %3 {offsets = [0, 32], sizes = [8, 8], strides = [1, 1]} : vector<8x48xf32> to vector<8x8xf32>
    %8 = vector.extract_strided_slice %3 {offsets = [0, 40], sizes = [8, 8], strides = [1, 1]} : vector<8x48xf32> to vector<8x8xf32>
    %9 = tpu.iota {dimensions = array<i32: 0>} : vector<8x8xi32>
    %10 = tpu.iota {dimensions = array<i32: 1>} : vector<8x8xi32>
    %11 = tpu.concatenate %9, %9, %9, %9 in 0 : vector<8x8xi32>, vector<8x8xi32>, vector<8x8xi32>, vector<8x8xi32> -> vector<32x8xi32>
    %12 = tpu.concatenate %10, %10, %10, %10 in 0 : vector<8x8xi32>, vector<8x8xi32>, vector<8x8xi32>, vector<8x8xi32> -> vector<32x8xi32>
    %13 = arith.cmpi sge, %11, %12 : vector<32x8xi32>
    %14 = vector.extract_strided_slice %6 {offsets = [0, 0], sizes = [8, 8], strides = [1, 1]} : vector<8x32xf32> to vector<8x8xf32>
    %15 = vector.extract_strided_slice %6 {offsets = [0, 8], sizes = [8, 8], strides = [1, 1]} : vector<8x32xf32> to vector<8x8xf32>
    %16 = vector.extract_strided_slice %6 {offsets = [0, 16], sizes = [8, 8], strides = [1, 1]} : vector<8x32xf32> to vector<8x8xf32>
    %17 = vector.extract_strided_slice %6 {offsets = [0, 24], sizes = [8, 8], strides = [1, 1]} : vector<8x32xf32> to vector<8x8xf32>
    %18 = tpu.concatenate %14, %15, %16, %17 in 0 : vector<8x8xf32>, vector<8x8xf32>, vector<8x8xf32>, vector<8x8xf32> -> vector<32x8xf32>
    %cst_5 = arith.constant dense<0.000000e+00> : vector<32x8xf32>
    %19 = tpu.matmul %18, %7, %cst_5 {dimension_numbers = #tpu.dot_dimension_numbers<[1], [1], [0], [0], [0, 0, 1, 0], [], []>} : vector<32x8xf32>, vector<8x8xf32>, vector<32x8xf32> -> vector<32x8xf32>
    %cst_6 = arith.constant 0xFF800000 : f32
    %20 = vector.broadcast %cst_6 : f32 to vector<32x8xf32>
    %21 = arith.select %13, %19, %20 : vector<32x8xi1>, vector<32x8xf32>
    %cst_7 = arith.constant dense<0xFF800000> : vector<32xf32>
    %22 = vector.multi_reduction <maximumf>, %21, %cst_7 [1] : vector<32x8xf32> to vector<32xf32>
    %23 = vector.shape_cast %22 : vector<32xf32> to vector<32x1xf32>
    %24 = vector.broadcast %23 : vector<32x1xf32> to vector<32x8xf32>
    %25 = arith.subf %21, %24 : vector<32x8xf32>
    %26 = math.exp %25 : vector<32x8xf32>
    %cst_8 = arith.constant dense<0.000000e+00> : vector<32xf32>
    %27 = vector.multi_reduction <add>, %26, %cst_8 [1] : vector<32x8xf32> to vector<32xf32>
    %28 = vector.shape_cast %27 : vector<32xf32> to vector<32x1xf32>
    %29 = tpu.reciprocal %28 {approx = true} : vector<32x1xf32> -> vector<32x1xf32>
    %30 = vector.broadcast %29 : vector<32x1xf32> to vector<32x8xf32>
    %31 = arith.mulf %26, %30 : vector<32x8xf32>
    %cst_9 = arith.constant dense<0.000000e+00> : vector<32x8xf32>
    %32 = tpu.matmul %31, %8, %cst_9 {dimension_numbers = #tpu.dot_dimension_numbers<[1], [0], [0], [1], [0, 0, 1, 1], [], []>} : vector<32x8xf32>, vector<8x8xf32>, vector<32x8xf32> -> vector<32x8xf32>
    %33 = vector.extract_strided_slice %32 {offsets = [0, 0], sizes = [8, 8], strides = [1, 1]} : vector<32x8xf32> to vector<8x8xf32>
    %34 = vector.extract_strided_slice %32 {offsets = [8, 0], sizes = [8, 8], strides = [1, 1]} : vector<32x8xf32> to vector<8x8xf32>
    %35 = vector.extract_strided_slice %32 {offsets = [16, 0], sizes = [8, 8], strides = [1, 1]} : vector<32x8xf32> to vector<8x8xf32>
    %36 = vector.extract_strided_slice %32 {offsets = [24, 0], sizes = [8, 8], strides = [1, 1]} : vector<32x8xf32> to vector<8x8xf32>
    %37 = tpu.concatenate %33, %34, %35, %36 in 1 : vector<8x8xf32>, vector<8x8xf32>, vector<8x8xf32>, vector<8x8xf32> -> vector<8x32xf32>
    %38 = vector.shape_cast %37 : vector<8x32xf32> to vector<1x8x32xf32>
    %c0_10 = arith.constant 0 : index
    %c0_11 = arith.constant 0 : index
    %c0_12 = arith.constant 0 : index
    %39 = vector.load %arg3[%c0_10, %c0_11, %c0_12] : memref<1x8x32xf32, #tpu.memory_space<vmem>>, vector<1x8x32xf32>
    tpu.vector_store %arg3[%c0_10, %c0_11, %c0_12], %38 {strides = array<i32>} : memref<1x8x32xf32, #tpu.memory_space<vmem>>, vector<1x8x32xf32>,
    return
  }
  func.func @transform_0(%arg0: i32) -> (i32, i32, i32) {
    %c0_i32 = arith.constant 0 : i32
    %c0_i32_0 = arith.constant 0 : i32
    %c0_i32_1 = arith.constant 0 : i32
    return %arg0, %c0_i32, %c0_i32_0 : i32, i32, i32
  }
  func.func @transform_1(%arg0: i32) -> (i32, i32) {
    %c0_i32 = arith.constant 0 : i32
    %c0_i32_0 = arith.constant 0 : i32
    %c0_i32_1 = arith.constant 0 : i32
    return %c0_i32, %c0_i32_0 : i32, i32
  }
  func.func @transform_2(%arg0: i32) -> (i32, i32, i32) {
    %c0_i32 = arith.constant 0 : i32
    %c0_i32_0 = arith.constant 0 : i32
    %c0_i32_1 = arith.constant 0 : i32
    return %arg0, %c0_i32, %c0_i32_0 : i32, i32, i32
  }
}

</mosaic_0001>

<bundles_post_ra>
// kernel: tpu_custom_call.1
= control target key start
LH: loop header
LB: loop body
LE: loop exit
PB: predicated region body
PF: predicated region fallthrough
CT: control target
= control target key end

     0   :  { %7 = vsyncpa [#allocation3], 0  ;;  %s1172_s0 = inlined_call_operand.hbm [shape: f32[2,8,32], index: 0, kind: input, shape index: {}]   ;;  %s1173_s1 = inlined_call_operand.hbm [shape: f32[32,48], index: 1, kind: input, shape index: {}]   ;;  %s1174_s2 = inlined_call_operand.hbm [shape: f32[2,8,32], index: 2, kind: output, shape index: {}]  }
   0x1   :  { %9 = vsyncpa [#allocation3 + $0x1], 0 }
   0x2   :  { %10 = vsyncpa [#allocation6], 0 }
   0x3   :  { %11 = vsyncpa [#allocation4], 0 }
   0x4   :  { %13 = vsyncpa [#allocation4 + $0x1], 0  ;;  %s946_s9 = smov 0   ;;  %s948_s10 = smov 0  }
   0x5   :  { %s950_s11 = smov 0   ;;  %s952_s12 = smov 0  }
   0x6 LB: > { %s967_s13 = sadd.s32 4294967295, %s913_s12   ;;  %s625_s14 = sadd.s32 4294967294, %s913_s12   ;;  %s913_s12 = sphi %s952_s12, %s1194_s12   ;;  %s909_s11 = sphi %s950_s11, %s1193_s11   ;;  %s905_s10 = sphi %s948_s10, %s1192_s10   ;;  %s901_s9 = sphi %s946_s9, %s1191_s9  }
   0x7   : > { %p39_p0 = scmp.ne.s32.totalorder %s905_s10, %s901_s9  ;;  %p1175_p1 = scmp.eq.s32.totalorder %s967_s13, 0 }
   0x8   : > { %p90_p3 = scmp.eq.s32.totalorder %s625_s14, 1  ;;  %p626_p5 = scmp.ge.s32.totalorder %s913_s12, 1 }
   0x9   : > { %p976_p4 = por %p1175_p1, %p39_p0  ;;  %p97_p7 = scmp.lt.s32.totalorder %s913_s12, 3 }
   0xa   : > { %p981_p6 = por %p90_p3, %p39_p0  ;;  %s915_s18 = smov [#allocation5]  }
   0xb   : > { %s1178_s15 = scalar_select %p976_p4, 1, 0 }
   0xc   : > { %s1179_s16 = scalar_select %p981_p6, 1, 0 }
   0xd   : > { %p986_p8 = pnand %p626_p5, %p97_p7  ;;  %s109_s19 = sshll.u32 %s915_s18, 4  ;;  %s990_s19 = int_to_ptr.vmem [resolvable:$true] %s109_s19 }
   0xe   : > { %s1002_s21 = sadd.s32 1, %s913_s12   ;;  %s26_s22 = sadd.s32 1, %s909_s11 }
   0xf   : > { %s1180_s17 = scalar_select %p986_p8, 1, 0 }
  0x10   : > { %p707_p9 = pneg %p986_p8  ;;  %s23_s23 = ssub.s32 %s913_s12, %s1002_s21 }
  0x11   : > { %s785_s26 = scalar_lea.hbm %s1173_s1, 512 }
  0x12   : > { %p997_p11 = pnand %p707_p9, %p1175_p1  ;;  %p786_p12 = scmp.ne.s32.totalorder %s1173_s1, %s785_s26 }
  0x13   : > { %p792_p5 = scmp.lt.u32.totalorder %s785_s26, %s1173_s1 }
  0x14   : > { %p787_p13 = pneg %p997_p11 }
  0x16   : > { %p788_p0 = pnand %p787_p13, %p786_p12 }
  0x18   : > { %p789_p3 = pneg %p788_p0 }
  0x1a   : > { %p794_p7 = pnand %p792_p5, %p789_p3 }
  0x1c   : > { %797 = shalt.err (!%p794_p7)
}
  0x1d   : > { %s798_s3 = scalar_lea.vmem %s990_s19, 512  ;;  %p806_p2 = scmp.lt.s32.totalorder %s990_s19, %s990_s19 }
  0x1e   : > { %p799_p9 = scmp.ne.s32.totalorder %s990_s19, %s798_s3  ;;  %p807_p6 = scmp.lt.s32.totalorder %s798_s3, %s798_s3 }
  0x20   : > { %p801_p10 = pnand %p799_p9, %p787_p13  ;;  %p808_p4 = por %p807_p6, %p806_p2 }
  0x22   : > { %p802_p1 = pneg %p801_p10 }
  0x24   : > { %p809_p8 = pnand %p808_p4, %p802_p1 }
  0x26   : > { %812 = shalt.err (!%p809_p8)
}
  0x27   : > { %s916_s4 = smov 128   ;;  %s917_s5 = smov 8  }
  0x28   : > { %710 = dma.hbm_to_vmem [thread:$0]  (!%p997_p11), %s1173_s1, 512, %s990_s19, [#allocation6], %s916_s4, %s916_s4, %s917_s5  }
  0x29   : > { %p24_p2 = scmp.eq.s32.totalorder %s23_s23, 0  ;;  %p33_p1 = scmp.ne.s32.totalorder %s909_s11, %s905_s10 }
  0x2a   : > { %p34_p4 = scmp.eq.s32.totalorder %s913_s12, 0  ;;  %p720_p6 = scmp.lt.s32.totalorder %s913_s12, 2 }
  0x2b   : > { %s1033_s8 = scalar_select %p24_p2, %s909_s11, %s26_s22  }
  0x2c   : > { %p35_p8 = por %p34_p4, %p33_p1  ;;  %p1182_p10 = scmp.eq.s32.totalorder %s967_s13, 1 }
  0x2d   : > { %s123_s18 = sand.u32 1, %s909_s11   ;;  %s630_s24 = sshll.u32 %s913_s12, 7 }
  0x2e   : > { %p1037_p12 = por %p1182_p10, %p33_p1  ;;  %s629_s25 = sshll.u32 %s123_s18, 3 }
  0x2f   : > { %s1046_s27 = scalar_lea.hbm %s1172_s0, %s630_s24  ;;  %s127_s19 = scalar_lea.vmem [#allocation2], %s629_s25 }
  0x30   : > { %s134_s22 = sshll.u32 %s127_s19, 4  ;;  %p1048_p11 = pnand %p720_p6, %p35_p8  ;;  %s1052_s22 = int_to_ptr.vmem [resolvable:$true] %s134_s22 }
  0x31   : > { %s124_s28 = scalar_lea.sflag [#allocation3], %s123_s18  ;;  %s813_s29 = scalar_lea.hbm %s1046_s27, 128 }
  0x32   : > { %p814_p13 = scmp.ne.s32.totalorder %s1046_s27, %s813_s29  ;;  %p815_p0 = pneg %p1048_p11 }
  0x33   : > { %s818_s4 = scalar_lea.hbm %s1172_s0, 256  ;;  %p819_p7 = scmp.lt.u32.totalorder %s1046_s27, %s1172_s0 }
  0x34   : > { %p816_p3 = pnand %p815_p0, %p814_p13  ;;  %p820_p9 = scmp.lt.u32.totalorder %s818_s4, %s813_s29 }
  0x35   : > { %p822_p1 = scmp.lt.u32.totalorder %s813_s29, %s1046_s27 }
  0x36   : > { %p817_p5 = pneg %p816_p3  ;;  %p821_p2 = por %p820_p9, %p819_p7 }
  0x38   : > { %p823_p4 = por %p822_p1, %p821_p2 }
  0x3a   : > { %p824_p6 = pnand %p823_p4, %p817_p5 }
  0x3c   : > { %827 = shalt.err (!%p824_p6)
}
  0x3d   : > { %s828_s7 = scalar_lea.vmem %s1052_s22, 128  ;;  %s918_s18 = smov [#allocation2]  }
  0x3e   : > { %p829_p8 = scmp.ne.s32.totalorder %s1052_s22, %s828_s7  ;;  %s833_s24 = sshll.u32 %s918_s18, 4  ;;  %s834_s24 = int_to_ptr.vmem [resolvable:$false] %s833_s24 }
  0x3f   : > { %s835_s25 = scalar_lea.vmem %s834_s24, 256  ;;  %p836_p3 = scmp.lt.s32.totalorder %s1052_s22, %s834_s24 }
  0x40   : > { %p831_p10 = pnand %p829_p8, %p815_p0  ;;  %p837_p7 = scmp.lt.s32.totalorder %s835_s25, %s828_s7 }
  0x42   : > { %p832_p13 = pneg %p831_p10  ;;  %p838_p9 = por %p837_p7, %p836_p3 }
  0x44   : > { %p839_p2 = pnand %p838_p9, %p832_p13 }
  0x46   : > { %842 = shalt.err (!%p839_p2)
}
  0x47   : > { %714 = dma.hbm_to_vmem [thread:$0]  (!%p1048_p11), %s1046_s27, 128, %s1052_s22, %s124_s28  }
  0x48   : > { %p1185_p5 = scmp.ne.s32.totalorder %s1180_s17, 0 }
  0x49   : > { %s1082_s20 = sand.u32 (!%p1185_p5), 1, %s905_s10   ;;  %p1186_p0 = scmp.ne.s32.totalorder (!%p1185_p5), %s1178_s15, 0 }
  0x4a   : > { %143 = sbr.rel (%p1185_p5) target bundleno = 1310 (0x51e), region = 28  ;;  %s632_s26 = sshll.u32 (!%p1185_p5), %s1082_s20, 3 }
  0x4b   : > { %s146_s19 = scalar_lea.sflag (!%p1185_p5), [#allocation3], %s1082_s20  ;;  %s149_s29 = scalar_lea.vmem (!%p1185_p5), [#allocation2], %s632_s26 }
  0x51   : > { %888 = dma.done.wait (%p1186_p0), %s146_s19, 128  }
  0x52   : > { %890 = vsyncadd (%p1186_p0), %s146_s19, 4294967168  ;;  %p1187_p11 = scmp.eq.s32.totalorder %s967_s13, 0 }
  0x54   : > { %892 = dma.done.wait (%p1187_p11), [#allocation6], 512   ;;  %p1188_p1 = pmov %p1187_p11 }
  0x55   : > { %v919_v0 = vmov 0.0|0.0   ;;  %vm920_vm0 = vmmov 0   ;;  %v921_v1 = vmov 0.0   ;;  %v175_v2 = vld [vmem:[#allocation5] sm:$0xff]  ;;  %v176_v3 = vld [vmem:[#allocation5 + $0x8] sm:$0xff]  ;;  %v177_v4 = vld [vmem:[#allocation5 + $0x10] sm:$0xff]  ;;  %v254_v16 = vlaneseq }
  0x56   : > { %894 = vsyncadd (%p1188_p1), [#allocation6], 4294966784  ;;  %691 = vmatprep.subr.bf16.mxu0 %v919_v0  ;;  %672 = vmatprep.mubr.msk.f32.mxu0 %vm920_vm0, %v921_v1  ;;  %v692_v5 = vpack.c.bf16 %v176_v3, %v175_v2  ;;  %v178_v6 = vld [vmem:[#allocation5 + $0x18] sm:$0xff]  ;;  %vm179_vm1 = vcmask 261120   ;;  %vm269_vm2 = vcmask 64512   ;;  %s922_s15 = smov 96  }
  0x57   : > { %v695_v7 = vpack.c.bf16 %v178_v6, %v177_v4  ;;  %v174_v8 = vld [vmem:[%s149_s29] sm:$0xff]  ;;  %s923_s17 = smov 112   ;;  %s924_s27 = smov 120   ;;  %v255_v17 = vshrl.u32 %v254_v16, 7  ;;  %v257_v18 = vand.u32 127, %v254_v16  ;;  %vm526_vm4 = vcmask 130048  }
  0x58   : > { %693 = vmatpush3.bf16.msra.mxu0 %v692_v5  ;;  %s925_s22 = smov 104   ;;  %s926_s23 = smov 88   ;;  %vm528_vm5 = vcmask 195584  }
  0x59   : > { %694 = vmatprep.subr.bf16.mxu0 %v919_v0  ;;  %vm258_vm3 = vcmp.ge.s32.totalorder %v255_v17, %v257_v18  ;;  %s927_s28 = smov 8   ;;  %s928_s30 = smov 16  }
  0x5a   : > { %s929_s3 = smov 24   ;;  %s646_s4 = sshll.u32 %s967_s13, 7 }
  0x5b   : > { %s173_s5 = scalar_lea.vmem [#allocation7], %s632_s26  ;;  %s1127_s24 = scalar_lea.hbm %s1174_s2, %s646_s4 }
  0x5c   : > { %696 = vmatpush3.bf16.msra.mxu0 %v695_v7  ;;  %s545_s6 = sshll.u32 %s173_s5, 4  ;;  %s532_s13 = scalar_lea.sflag [#allocation4], %s1082_s20  ;;  %s1129_s6 = int_to_ptr.vmem [resolvable:$true] %s545_s6 }
  0x5d   : > { %s843_s25 = scalar_lea.vmem %s1129_s6, 128  ;;  %s930_s26 = smov [#allocation7]  }
  0x5e   : > { %p844_p4 = scmp.ne.s32.totalorder %s1129_s6, %s843_s25  ;;  %s847_s19 = sshll.u32 %s930_s26, 4  ;;  %s848_s19 = int_to_ptr.vmem [resolvable:$false] %s847_s19 }
  0x5f   : > { %673 = vmatmul.mubr.msk.f32.vlgmr.msra.gmra.mrb[0].mxu0 %vm179_vm1, %v174_v8  ;;  %s849_s29 = scalar_lea.vmem %s848_s19, 256  ;;  %p850_p10 = scmp.lt.s32.totalorder %s1129_s6, %s848_s19 }
  0x60   : > { %p845_p6 = pnand %p844_p4, %p1037_p12  ;;  %p851_p13 = scmp.lt.s32.totalorder %s849_s29, %s843_s25 }
  0x62   : > { %p846_p8 = pneg %p845_p6  ;;  %p852_p3 = por %p851_p13, %p850_p10 }
  0x64   : > { %p853_p7 = pnand %p852_p3, %p846_p8 }
 0x132   : > { %v1097_v9 = vpop.f32.mrb[0].mxu0 }
 0x133   : > { %v253_v10 = vmul.f32 0.35355338, %v1097_v9  ;;  %267 = vrot.lane.b32.xlu0 %v1097_v9, %s922_s15  ;;  %v674_v11 = vpop.f32.mrb[1].mxu0 }
 0x135   : > { %262 = vrot.lane.b32.xlu1 %v253_v10, %s923_s17  ;;  %677 = vmatprep.mubr.msk.f32.mxu1 %vm269_vm2, %v253_v10 }
 0x137   : > { %260 = vrot.lane.b32.xlu0 %v253_v10, %s924_s27 }
 0x139   : > { %264 = vrot.lane.b32.xlu1 %v253_v10, %s925_s22 }
 0x1a5   : > { %v268_v12 = vpop.permute.xlu0 %267 }
 0x1a6   : > { %675 = vmatprep.subr.msk.mxu1 %vm269_vm2, %v268_v12 }
 0x1a7   : > { %676 = vmatpush3.xpose.msk.msra.mxu1 %vm269_vm2, %v268_v12  ;;  %v263_v13 = vpop.permute.xlu1 %262 }
 0x1a9   : > { %v261_v14 = vpop.permute.xlu0 %260 }
 0x1aa   : > { %678 = vmatmul.mubr.msk.f32.vlgmr.msra.gmra.mrb[0].mxu1 %vm269_vm2, %v261_v14 }
 0x1ab   : > { %680 = vmatprep.mubr.msk.f32.mxu1 %vm269_vm2, %v263_v13  ;;  %v265_v15 = vpop.permute.xlu1 %264 }
 0x1ae   : > { %681 = vmatmul.mubr.msk.f32.gmra.mrb[2].mxu1 %vm269_vm2, %v265_v15 }
 0x27d   : > { %v679_v19 = vpop.f32.mrb[0].mxu1 }
 0x27e   : > { %v346_v20 = vpop.f32.mrb[1].mxu1  ;;  %v366_v23 = vsel %vm258_vm3, %v679_v19, -inf }
 0x27f   : > { %v365_v21 = vsel %vm258_vm3, %v346_v20, -inf  ;;  %v372_v27 = vsel %vm269_vm2, %v366_v23, -inf }
 0x280   : > { %v369_v22 = vsel %vm269_vm2, %v365_v21, -inf }
 0x281   : > { %370 = vmax.xlane.f32.xlu0 %v369_v22  ;;  %v682_v24 = vpop.f32.mrb[2].mxu1 }
 0x282   : > { %v356_v25 = vpop.f32.mrb[3].mxu1  ;;  %v368_v29 = vsel %vm258_vm3, %v682_v24, -inf }
 0x283   : > { %v367_v26 = vsel %vm258_vm3, %v356_v25, -inf  ;;  %v378_v30 = vsel %vm269_vm2, %v368_v29, -inf }
 0x284   : > { %v375_v28 = vsel %vm269_vm2, %v367_v26, -inf }
 0x285   : > { %373 = vmax.xlane.f32.xlu0 %v372_v27  ;;  %376 = vmax.xlane.f32.xlu1 %v375_v28 }
 0x289   : > { %379 = vmax.xlane.f32.xlu0 %v378_v30 }
 0x30e   : > { %v371_v31 = vpop.xlane.xlu0 %370 }
 0x30f   : > { %v381_v32 = vsub.f32 %v365_v21, %v371_v31 }
 0x311   : > { %v385_v37 = vmul.f32 1.442695, %v381_v32 }
 0x312   : > { %v374_v33 = vpop.xlane.xlu0 %373  ;;  %v377_v34 = vpop.xlane.xlu1 %376 }
 0x313   : > { %v382_v35 = vsub.f32 %v366_v23, %v374_v33  ;;  %v383_v36 = vsub.f32 %v367_v26, %v377_v34 }
 0x315   : > { %v387_v38 = vmul.f32 1.442695, %v382_v35  ;;  %v389_v39 = vmul.f32 1.442695, %v383_v36 }
 0x316   : > { %v380_v40 = vpop.xlane.xlu0 %379 }
 0x317   : > { %769 = vpow2.f32 %v387_v38  ;;  %v384_v41 = vsub.f32 %v368_v29, %v380_v40 }
 0x318   : > { %771 = vpow2.f32 %v389_v39 }
 0x319   : > { %773 = vpow2.f32 %v385_v37  ;;  %v391_v42 = vmul.f32 1.442695, %v384_v41 }
 0x31b   : > { %775 = vpow2.f32 %v391_v42 }
 0x321   : > { %v770_v43 = vpop.eup %769 }
 0x322   : > { %v772_v44 = vpop.eup %771  ;;  %v396_v45 = vsel %vm269_vm2, %v770_v43, 0.0 }
 0x323   : > { %v774_v46 = vpop.eup %773  ;;  %397 = vadd.xlane.f32.xlu1 %v396_v45  ;;  %v399_v47 = vsel %vm269_vm2, %v772_v44, 0.0 }
 0x324   : > { %400 = vadd.xlane.f32.xlu0 %v399_v47  ;;  %v393_v49 = vsel %vm269_vm2, %v774_v46, 0.0 }
 0x325   : > { %v776_v48 = vpop.eup %775 }
 0x326   : > { %v402_v50 = vsel %vm269_vm2, %v776_v48, 0.0 }
 0x327   : > { %394 = vadd.xlane.f32.xlu1 %v393_v49 }
 0x328   : > { %403 = vadd.xlane.f32.xlu0 %v402_v50 }
 0x338   : > { %413 = vrot.lane.b32.xlu1 %v1097_v9, %s926_s23 }
 0x3b0   : > { %v398_v51 = vpop.xlane.xlu1 %397 }
 0x3b1   : > { %v401_v52 = vpop.xlane.xlu0 %400 }
 0x3b2   : > { %777 = vrcp.f32 %v401_v52 }
 0x3b3   : > { %779 = vrcp.f32 %v398_v51 }
 0x3b4   : > { %v395_v53 = vpop.xlane.xlu1 %394 }
 0x3b5   : > { %v404_v54 = vpop.xlane.xlu0 %403  ;;  %781 = vrcp.f32 %v395_v53 }
 0x3b6   : > { %783 = vrcp.f32 %v404_v54 }
 0x3b8   : > { %v414_v55 = vpop.permute.xlu1 %413 }
 0x3b9   : > { %683 = vmatprep.subr.mxu0 %v414_v55  ;;  %697 = vmatprep.subr.mxu1 %v414_v55 }
 0x3ba   : > { %684 = vmatpush3.msra.mxu0 %v414_v55  ;;  %698 = vmatpush3.msra.mxu1 %v414_v55 }
 0x3bc   : > { %v778_v56 = vpop.eup %777 }
 0x3bd   : > { %v411_v57 = vmul.f32 %v778_v56, %v772_v44  ;;  %v780_v58 = vpop.eup %779 }
 0x3be   : > { %v410_v62 = vmul.f32 %v780_v58, %v770_v43 }
 0x3bf   : > { %v782_v59 = vpop.eup %781  ;;  %688 = vmatprep.mubr.msk.f32.mxu1 %vm269_vm2, %v411_v57 }
 0x3c0   : > { %v784_v60 = vpop.eup %783  ;;  %v409_v61 = vmul.f32 %v782_v59, %v774_v46 }
 0x3c1   : > { %v412_v63 = vmul.f32 %v784_v60, %v776_v48 }
 0x3c2   : > { %685 = vmatprep.mubr.msk.f32.mxu0 %vm269_vm2, %v409_v61 }
 0x3c3   : > { %689 = vmatmul.mubr.msk.f32.vlgmr.msra.gmra.mrb[4].mxu1 %vm269_vm2, %v412_v63  ;;  %686 = vmatmul.mubr.msk.f32.vlgmr.msra.gmra.mrb[2].mxu0 %vm269_vm2, %v410_v62 }
 0x496   : > { %v690_v0 = vpop.f32.mrb[4].mxu1  ;;  %v687_v1 = vpop.f32.mrb[2].mxu0 }
 0x497   : > { %v504_v2 = vpop.f32.mrb[5].mxu1  ;;  %514 = vrot.lane.b32.xlu0 %v687_v1, %s927_s28  ;;  %v494_v3 = vpop.f32.mrb[3].mxu0 }
 0x498   : > { %518 = vrot.lane.b32.xlu1 %v504_v2, %s928_s30 }
 0x49c   : > { %522 = vrot.lane.b32.xlu1 %v690_v0, %s929_s3 }
 0x509   : > { %v515_v4 = vpop.permute.xlu0 %514 }
 0x50a   : > { %v519_v5 = vpop.permute.xlu1 %518  ;;  %v525_v6 = vsel %vm269_vm2, %v494_v3, %v515_v4 }
 0x50b   : > { %v527_v8 = vsel %vm526_vm4, %v525_v6, %v519_v5 }
 0x50e   : > { %v523_v7 = vpop.permute.xlu1 %522 }
 0x50f   : > { %v529_v9 = vsel %vm528_vm5, %v527_v8, %v523_v7 }
 0x510   : > { %530 = vst.msk [vmem:[%s173_s5] sm:$0xff] %vm179_vm1, %v529_v9 }
 0x511   : > { %856 = shalt.err (!%p853_p7)
}
 0x512   : > { %s857_s20 = scalar_lea.hbm %s1127_s24, 128  ;;  %s861_s27 = scalar_lea.hbm %s1174_s2, 256 }
 0x513   : > { %p858_p9 = scmp.ne.s32.totalorder %s1127_s24, %s857_s20  ;;  %p862_p0 = scmp.lt.u32.totalorder %s1127_s24, %s1174_s2 }
 0x514   : > { %p863_p11 = scmp.lt.u32.totalorder %s861_s27, %s857_s20  ;;  %p865_p4 = scmp.lt.u32.totalorder %s857_s20, %s1127_s24 }
 0x515   : > { %p859_p2 = pnand %p858_p9, %p1037_p12 }
 0x516   : > { %p864_p1 = por %p863_p11, %p862_p0 }
 0x517   : > { %p860_p5 = pneg %p859_p2 }
 0x518   : > { %p866_p6 = por %p865_p4, %p864_p1 }
 0x51a   : > { %p867_p8 = pnand %p866_p6, %p860_p5 }
 0x51c   : > { %870 = shalt.err (!%p867_p8)
}
 0x51d   : > { %705 = dma.vmem_to_hbm [thread:$0]  (%p1037_p12), %s1129_s6, 128, %s1127_s24, %s532_s13  }
 0x51e PF: > { %s557_s28 = sand.u32 1, %s901_s9   ;;  %p1189_p10 = scmp.ne.s32.totalorder %s1179_s16, 0 }
 0x51f   : > { %p1190_p13 = scmp.ge.s32.totalorder %s913_s12, 2  ;;  %s558_s30 = scalar_lea.sflag [#allocation4], %s557_s28 }
 0x521   : > { %p716_p3 = pnand %p1190_p13, %p1189_p10 }
 0x523   : > { %896 = dma.done.wait (!%p716_p3), %s558_s30, 128  }
 0x524   : > { %898 = vsyncadd (!%p716_p3), %s558_s30, 4294967168  ;;  %p16_p7 = scmp.ge.s32.totalorder %s1002_s21, 4   ;;  %s1191_s9 = smov %s905_s10 }
 0x525   : > { %s1192_s10 = smov %s909_s11  ;;  %s1193_s11 = smov %s1033_s8 }
 0x526   : > { %s1194_s12 = smov %s1002_s21  ;;  %18 = sbr.rel (!%p16_p7) target bundleno = 6 (0x6), region = 77 }
 0x52d   :  { %563 = vsyncpa [#allocation3], 1 }
 0x52e   :  { %565 = vsyncpa [#allocation3 + $0x1], 1 }
 0x52f   :  { %566 = vsyncpa [#allocation6], 1 }
 0x530   :  { %567 = vsyncpa [#allocation4], 1 }
 0x531   :  { %569 = vsyncpa [#allocation4 + $0x1], 1 }

// kernel: tpu_custom_call.1
= control target key start
LH: loop header
LB: loop body
LE: loop exit
PB: predicated region body
PF: predicated region fallthrough
CT: control target
= control target key end

     0   :  { %7 = vsyncpa [#allocation3], 0  ;;  %s1172_s0 = inlined_call_operand.hbm [shape: f32[2,8,32], index: 0, kind: input, shape index: {}]   ;;  %s1173_s1 = inlined_call_operand.hbm [shape: f32[32,48], index: 1, kind: input, shape index: {}]   ;;  %s1174_s2 = inlined_call_operand.hbm [shape: f32[2,8,32], index: 2, kind: output, shape index: {}]  }
   0x1   :  { %9 = vsyncpa [#allocation3 + $0x1], 0 }
   0x2   :  { %10 = vsyncpa [#allocation6], 0 }
   0x3   :  { %11 = vsyncpa [#allocation4], 0 }
   0x4   :  { %13 = vsyncpa [#allocation4 + $0x1], 0  ;;  %s946_s9 = smov 0   ;;  %s948_s10 = smov 0  }
   0x5   :  { %s950_s11 = smov 0   ;;  %s952_s12 = smov 0  }
   0x6 LB: > { %s967_s13 = sadd.s32 4294967295, %s913_s12   ;;  %s625_s14 = sadd.s32 4294967294, %s913_s12   ;;  %s913_s12 = sphi %s952_s12, %s1194_s12   ;;  %s909_s11 = sphi %s950_s11, %s1193_s11   ;;  %s905_s10 = sphi %s948_s10, %s1192_s10   ;;  %s901_s9 = sphi %s946_s9, %s1191_s9  }
   0x7   : > { %p39_p0 = scmp.ne.s32.totalorder %s905_s10, %s901_s9  ;;  %p1175_p1 = scmp.eq.s32.totalorder %s967_s13, 0 }
   0x8   : > { %p90_p3 = scmp.eq.s32.totalorder %s625_s14, 1  ;;  %p626_p5 = scmp.ge.s32.totalorder %s913_s12, 1 }
   0x9   : > { %p976_p4 = por %p1175_p1, %p39_p0  ;;  %p97_p7 = scmp.lt.s32.totalorder %s913_s12, 3 }
   0xa   : > { %p981_p6 = por %p90_p3, %p39_p0  ;;  %s915_s18 = smov [#allocation5]  }
   0xb   : > { %s1178_s15 = scalar_select %p976_p4, 1, 0 }
   0xc   : > { %s1179_s16 = scalar_select %p981_p6, 1, 0 }
   0xd   : > { %p986_p8 = pnand %p626_p5, %p97_p7  ;;  %s109_s19 = sshll.u32 %s915_s18, 4  ;;  %s990_s19 = int_to_ptr.vmem [resolvable:$true] %s109_s19 }
   0xe   : > { %s1002_s21 = sadd.s32 1, %s913_s12   ;;  %s26_s22 = sadd.s32 1, %s909_s11 }
   0xf   : > { %s1180_s17 = scalar_select %p986_p8, 1, 0 }
  0x10   : > { %p707_p9 = pneg %p986_p8  ;;  %s23_s23 = ssub.s32 %s913_s12, %s1002_s21 }
  0x11   : > { %s785_s26 = scalar_lea.hbm %s1173_s1, 512 }
  0x12   : > { %p997_p11 = pnand %p707_p9, %p1175_p1  ;;  %p786_p12 = scmp.ne.s32.totalorder %s1173_s1, %s785_s26 }
  0x13   : > { %p792_p5 = scmp.lt.u32.totalorder %s785_s26, %s1173_s1 }
  0x14   : > { %p787_p13 = pneg %p997_p11 }
  0x16   : > { %p788_p0 = pnand %p787_p13, %p786_p12 }
  0x18   : > { %p789_p3 = pneg %p788_p0 }
  0x1a   : > { %p794_p7 = pnand %p792_p5, %p789_p3 }
  0x1c   : > { %797 = shalt.err (!%p794_p7)
}
  0x1d   : > { %s798_s3 = scalar_lea.vmem %s990_s19, 512  ;;  %p806_p2 = scmp.lt.s32.totalorder %s990_s19, %s990_s19 }
  0x1e   : > { %p799_p9 = scmp.ne.s32.totalorder %s990_s19, %s798_s3  ;;  %p807_p6 = scmp.lt.s32.totalorder %s798_s3, %s798_s3 }
  0x20   : > { %p801_p10 = pnand %p799_p9, %p787_p13  ;;  %p808_p4 = por %p807_p6, %p806_p2 }
  0x22   : > { %p802_p1 = pneg %p801_p10 }
  0x24   : > { %p809_p8 = pnand %p808_p4, %p802_p1 }
  0x26   : > { %812 = shalt.err (!%p809_p8)
}
  0x27   : > { %s916_s4 = smov 128   ;;  %s917_s5 = smov 8  }
  0x28   : > { %710 = dma.hbm_to_vmem [thread:$0]  (!%p997_p11), %s1173_s1, 512, %s990_s19, [#allocation6], %s916_s4, %s916_s4, %s917_s5  }
  0x29   : > { %p24_p2 = scmp.eq.s32.totalorder %s23_s23, 0  ;;  %p33_p1 = scmp.ne.s32.totalorder %s909_s11, %s905_s10 }
  0x2a   : > { %p34_p4 = scmp.eq.s32.totalorder %s913_s12, 0  ;;  %p720_p6 = scmp.lt.s32.totalorder %s913_s12, 2 }
  0x2b   : > { %s1033_s8 = scalar_select %p24_p2, %s909_s11, %s26_s22  }
  0x2c   : > { %p35_p8 = por %p34_p4, %p33_p1  ;;  %p1182_p10 = scmp.eq.s32.totalorder %s967_s13, 1 }
  0x2d   : > { %s123_s18 = sand.u32 1, %s909_s11   ;;  %s630_s24 = sshll.u32 %s913_s12, 7 }
  0x2e   : > { %p1037_p12 = por %p1182_p10, %p33_p1  ;;  %s629_s25 = sshll.u32 %s123_s18, 3 }
  0x2f   : > { %s1046_s27 = scalar_lea.hbm %s1172_s0, %s630_s24  ;;  %s127_s19 = scalar_lea.vmem [#allocation2], %s629_s25 }
  0x30   : > { %s134_s22 = sshll.u32 %s127_s19, 4  ;;  %p1048_p11 = pnand %p720_p6, %p35_p8  ;;  %s1052_s22 = int_to_ptr.vmem [resolvable:$true] %s134_s22 }
  0x31   : > { %s124_s28 = scalar_lea.sflag [#allocation3], %s123_s18  ;;  %s813_s29 = scalar_lea.hbm %s1046_s27, 128 }
  0x32   : > { %p814_p13 = scmp.ne.s32.totalorder %s1046_s27, %s813_s29  ;;  %p815_p0 = pneg %p1048_p11 }
  0x33   : > { %s818_s4 = scalar_lea.hbm %s1172_s0, 256  ;;  %p819_p7 = scmp.lt.u32.totalorder %s1046_s27, %s1172_s0 }
  0x34   : > { %p816_p3 = pnand %p815_p0, %p814_p13  ;;  %p820_p9 = scmp.lt.u32.totalorder %s818_s4, %s813_s29 }
  0x35   : > { %p822_p1 = scmp.lt.u32.totalorder %s813_s29, %s1046_s27 }
  0x36   : > { %p817_p5 = pneg %p816_p3  ;;  %p821_p2 = por %p820_p9, %p819_p7 }
  0x38   : > { %p823_p4 = por %p822_p1, %p821_p2 }
  0x3a   : > { %p824_p6 = pnand %p823_p4, %p817_p5 }
  0x3c   : > { %827 = shalt.err (!%p824_p6)
}
  0x3d   : > { %s828_s7 = scalar_lea.vmem %s1052_s22, 128  ;;  %s918_s18 = smov [#allocation2]  }
  0x3e   : > { %p829_p8 = scmp.ne.s32.totalorder %s1052_s22, %s828_s7  ;;  %s833_s24 = sshll.u32 %s918_s18, 4  ;;  %s834_s24 = int_to_ptr.vmem [resolvable:$false] %s833_s24 }
  0x3f   : > { %s835_s25 = scalar_lea.vmem %s834_s24, 256  ;;  %p836_p3 = scmp.lt.s32.totalorder %s1052_s22, %s834_s24 }
  0x40   : > { %p831_p10 = pnand %p829_p8, %p815_p0  ;;  %p837_p7 = scmp.lt.s32.totalorder %s835_s25, %s828_s7 }
  0x42   : > { %p832_p13 = pneg %p831_p10  ;;  %p838_p9 = por %p837_p7, %p836_p3 }
  0x44   : > { %p839_p2 = pnand %p838_p9, %p832_p13 }
  0x46   : > { %842 = shalt.err (!%p839_p2)
}
  0x47   : > { %714 = dma.hbm_to_vmem [thread:$0]  (!%p1048_p11), %s1046_s27, 128, %s1052_s22, %s124_s28  }
  0x48   : > { %p1185_p5 = scmp.ne.s32.totalorder %s1180_s17, 0 }
  0x49   : > { %s1082_s20 = sand.u32 (!%p1185_p5), 1, %s905_s10   ;;  %p1186_p0 = scmp.ne.s32.totalorder (!%p1185_p5), %s1178_s15, 0 }
  0x4a   : > { %143 = sbr.rel (%p1185_p5) target bundleno = 1310 (0x51e), region = 28  ;;  %s632_s26 = sshll.u32 (!%p1185_p5), %s1082_s20, 3 }
  0x4b   : > { %s146_s19 = scalar_lea.sflag (!%p1185_p5), [#allocation3], %s1082_s20  ;;  %s149_s29 = scalar_lea.vmem (!%p1185_p5), [#allocation2], %s632_s26 }
  0x51   : > { %888 = dma.done.wait (%p1186_p0), %s146_s19, 128  }
  0x52   : > { %890 = vsyncadd (%p1186_p0), %s146_s19, 4294967168  ;;  %p1187_p11 = scmp.eq.s32.totalorder %s967_s13, 0 }
  0x54   : > { %892 = dma.done.wait (%p1187_p11), [#allocation6], 512   ;;  %p1188_p1 = pmov %p1187_p11 }
  0x55   : > { %v919_v0 = vmov 0.0|0.0   ;;  %vm920_vm0 = vmmov 0   ;;  %v921_v1 = vmov 0.0   ;;  %v175_v2 = vld [vmem:[#allocation5] sm:$0xff]  ;;  %v176_v3 = vld [vmem:[#allocation5 + $0x8] sm:$0xff]  ;;  %v177_v4 = vld [vmem:[#allocation5 + $0x10] sm:$0xff]  ;;  %v254_v16 = vlaneseq }
  0x56   : > { %894 = vsyncadd (%p1188_p1), [#allocation6], 4294966784  ;;  %691 = vmatprep.subr.bf16.mxu0 %v919_v0  ;;  %672 = vmatprep.mubr.msk.f32.mxu0 %vm920_vm0, %v921_v1  ;;  %v692_v5 = vpack.c.bf16 %v176_v3, %v175_v2  ;;  %v178_v6 = vld [vmem:[#allocation5 + $0x18] sm:$0xff]  ;;  %vm179_vm1 = vcmask 261120   ;;  %vm269_vm2 = vcmask 64512   ;;  %s922_s15 = smov 96  }
  0x57   : > { %v695_v7 = vpack.c.bf16 %v178_v6, %v177_v4  ;;  %v174_v8 = vld [vmem:[%s149_s29] sm:$0xff]  ;;  %s923_s17 = smov 112   ;;  %s924_s27 = smov 120   ;;  %v255_v17 = vshrl.u32 %v254_v16, 7  ;;  %v257_v18 = vand.u32 127, %v254_v16  ;;  %vm526_vm4 = vcmask 130048  }
  0x58   : > { %693 = vmatpush3.bf16.msra.mxu0 %v692_v5  ;;  %s925_s22 = smov 104   ;;  %s926_s23 = smov 88   ;;  %vm528_vm5 = vcmask 195584  }
  0x59   : > { %694 = vmatprep.subr.bf16.mxu0 %v919_v0  ;;  %vm258_vm3 = vcmp.ge.s32.totalorder %v255_v17, %v257_v18  ;;  %s927_s28 = smov 8   ;;  %s928_s30 = smov 16  }
  0x5a   : > { %s929_s3 = smov 24   ;;  %s646_s4 = sshll.u32 %s967_s13, 7 }
  0x5b   : > { %s173_s5 = scalar_lea.vmem [#allocation7], %s632_s26  ;;  %s1127_s24 = scalar_lea.hbm %s1174_s2, %s646_s4 }
  0x5c   : > { %696 = vmatpush3.bf16.msra.mxu0 %v695_v7  ;;  %s545_s6 = sshll.u32 %s173_s5, 4  ;;  %s532_s13 = scalar_lea.sflag [#allocation4], %s1082_s20  ;;  %s1129_s6 = int_to_ptr.vmem [resolvable:$true] %s545_s6 }
  0x5d   : > { %s843_s25 = scalar_lea.vmem %s1129_s6, 128  ;;  %s930_s26 = smov [#allocation7]  }
  0x5e   : > { %p844_p4 = scmp.ne.s32.totalorder %s1129_s6, %s843_s25  ;;  %s847_s19 = sshll.u32 %s930_s26, 4  ;;  %s848_s19 = int_to_ptr.vmem [resolvable:$false] %s847_s19 }
  0x5f   : > { %673 = vmatmul.mubr.msk.f32.vlgmr.msra.gmra.mrb[0].mxu0 %vm179_vm1, %v174_v8  ;;  %s849_s29 = scalar_lea.vmem %s848_s19, 256  ;;  %p850_p10 = scmp.lt.s32.totalorder %s1129_s6, %s848_s19 }
  0x60   : > { %p845_p6 = pnand %p844_p4, %p1037_p12  ;;  %p851_p13 = scmp.lt.s32.totalorder %s849_s29, %s843_s25 }
  0x62   : > { %p846_p8 = pneg %p845_p6  ;;  %p852_p3 = por %p851_p13, %p850_p10 }
  0x64   : > { %p853_p7 = pnand %p852_p3, %p846_p8 }
 0x132   : > { %v1097_v9 = vpop.f32.mrb[0].mxu0 }
 0x133   : > { %v253_v10 = vmul.f32 0.35355338, %v1097_v9  ;;  %267 = vrot.lane.b32.xlu0 %v1097_v9, %s922_s15  ;;  %v674_v11 = vpop.f32.mrb[1].mxu0 }
 0x135   : > { %262 = vrot.lane.b32.xlu1 %v253_v10, %s923_s17  ;;  %677 = vmatprep.mubr.msk.f32.mxu1 %vm269_vm2, %v253_v10 }
 0x137   : > { %260 = vrot.lane.b32.xlu0 %v253_v10, %s924_s27 }
 0x139   : > { %264 = vrot.lane.b32.xlu1 %v253_v10, %s925_s22 }
 0x1a5   : > { %v268_v12 = vpop.permute.xlu0 %267 }
 0x1a6   : > { %675 = vmatprep.subr.msk.mxu1 %vm269_vm2, %v268_v12 }
 0x1a7   : > { %676 = vmatpush3.xpose.msk.msra.mxu1 %vm269_vm2, %v268_v12  ;;  %v263_v13 = vpop.permute.xlu1 %262 }
 0x1a9   : > { %v261_v14 = vpop.permute.xlu0 %260 }
 0x1aa   : > { %678 = vmatmul.mubr.msk.f32.vlgmr.msra.gmra.mrb[0].mxu1 %vm269_vm2, %v261_v14 }
 0x1ab   : > { %680 = vmatprep.mubr.msk.f32.mxu1 %vm269_vm2, %v263_v13  ;;  %v265_v15 = vpop.permute.xlu1 %264 }
 0x1ae   : > { %681 = vmatmul.mubr.msk.f32.gmra.mrb[2].mxu1 %vm269_vm2, %v265_v15 }
 0x27d   : > { %v679_v19 = vpop.f32.mrb[0].mxu1 }
 0x27e   : > { %v346_v20 = vpop.f32.mrb[1].mxu1  ;;  %v366_v23 = vsel %vm258_vm3, %v679_v19, -inf }
 0x27f   : > { %v365_v21 = vsel %vm258_vm3, %v346_v20, -inf  ;;  %v372_v27 = vsel %vm269_vm2, %v366_v23, -inf }
 0x280   : > { %v369_v22 = vsel %vm269_vm2, %v365_v21, -inf }
 0x281   : > { %370 = vmax.xlane.f32.xlu0 %v369_v22  ;;  %v682_v24 = vpop.f32.mrb[2].mxu1 }
 0x282   : > { %v356_v25 = vpop.f32.mrb[3].mxu1  ;;  %v368_v29 = vsel %vm258_vm3, %v682_v24, -inf }
 0x283   : > { %v367_v26 = vsel %vm258_vm3, %v356_v25, -inf  ;;  %v378_v30 = vsel %vm269_vm2, %v368_v29, -inf }
 0x284   : > { %v375_v28 = vsel %vm269_vm2, %v367_v26, -inf }
 0x285   : > { %373 = vmax.xlane.f32.xlu0 %v372_v27  ;;  %376 = vmax.xlane.f32.xlu1 %v375_v28 }
 0x289   : > { %379 = vmax.xlane.f32.xlu0 %v378_v30 }
 0x30e   : > { %v371_v31 = vpop.xlane.xlu0 %370 }
 0x30f   : > { %v381_v32 = vsub.f32 %v365_v21, %v371_v31 }
 0x311   : > { %v385_v37 = vmul.f32 1.442695, %v381_v32 }
 0x312   : > { %v374_v33 = vpop.xlane.xlu0 %373  ;;  %v377_v34 = vpop.xlane.xlu1 %376 }
 0x313   : > { %v382_v35 = vsub.f32 %v366_v23, %v374_v33  ;;  %v383_v36 = vsub.f32 %v367_v26, %v377_v34 }
 0x315   : > { %v387_v38 = vmul.f32 1.442695, %v382_v35  ;;  %v389_v39 = vmul.f32 1.442695, %v383_v36 }
 0x316   : > { %v380_v40 = vpop.xlane.xlu0 %379 }
 0x317   : > { %769 = vpow2.f32 %v387_v38  ;;  %v384_v41 = vsub.f32 %v368_v29, %v380_v40 }
 0x318   : > { %771 = vpow2.f32 %v389_v39 }
 0x319   : > { %773 = vpow2.f32 %v385_v37  ;;  %v391_v42 = vmul.f32 1.442695, %v384_v41 }
 0x31b   : > { %775 = vpow2.f32 %v391_v42 }
 0x321   : > { %v770_v43 = vpop.eup %769 }
 0x322   : > { %v772_v44 = vpop.eup %771  ;;  %v396_v45 = vsel %vm269_vm2, %v770_v43, 0.0 }
 0x323   : > { %v774_v46 = vpop.eup %773  ;;  %397 = vadd.xlane.f32.xlu1 %v396_v45  ;;  %v399_v47 = vsel %vm269_vm2, %v772_v44, 0.0 }
 0x324   : > { %400 = vadd.xlane.f32.xlu0 %v399_v47  ;;  %v393_v49 = vsel %vm269_vm2, %v774_v46, 0.0 }
 0x325   : > { %v776_v48 = vpop.eup %775 }
 0x326   : > { %v402_v50 = vsel %vm269_vm2, %v776_v48, 0.0 }
 0x327   : > { %394 = vadd.xlane.f32.xlu1 %v393_v49 }
 0x328   : > { %403 = vadd.xlane.f32.xlu0 %v402_v50 }
 0x338   : > { %413 = vrot.lane.b32.xlu1 %v1097_v9, %s926_s23 }
 0x3b0   : > { %v398_v51 = vpop.xlane.xlu1 %397 }
 0x3b1   : > { %v401_v52 = vpop.xlane.xlu0 %400 }
 0x3b2   : > { %777 = vrcp.f32 %v401_v52 }
 0x3b3   : > { %779 = vrcp.f32 %v398_v51 }
 0x3b4   : > { %v395_v53 = vpop.xlane.xlu1 %394 }
 0x3b5   : > { %v404_v54 = vpop.xlane.xlu0 %403  ;;  %781 = vrcp.f32 %v395_v53 }
 0x3b6   : > { %783 = vrcp.f32 %v404_v54 }
 0x3b8   : > { %v414_v55 = vpop.permute.xlu1 %413 }
 0x3b9   : > { %683 = vmatprep.subr.mxu0 %v414_v55  ;;  %697 = vmatprep.subr.mxu1 %v414_v55 }
 0x3ba   : > { %684 = vmatpush3.msra.mxu0 %v414_v55  ;;  %698 = vmatpush3.msra.mxu1 %v414_v55 }
 0x3bc   : > { %v778_v56 = vpop.eup %777 }
 0x3bd   : > { %v411_v57 = vmul.f32 %v778_v56, %v772_v44  ;;  %v780_v58 = vpop.eup %779 }
 0x3be   : > { %v410_v62 = vmul.f32 %v780_v58, %v770_v43 }
 0x3bf   : > { %v782_v59 = vpop.eup %781  ;;  %688 = vmatprep.mubr.msk.f32.mxu1 %vm269_vm2, %v411_v57 }
 0x3c0   : > { %v784_v60 = vpop.eup %783  ;;  %v409_v61 = vmul.f32 %v782_v59, %v774_v46 }
 0x3c1   : > { %v412_v63 = vmul.f32 %v784_v60, %v776_v48 }
 0x3c2   : > { %685 = vmatprep.mubr.msk.f32.mxu0 %vm269_vm2, %v409_v61 }
 0x3c3   : > { %689 = vmatmul.mubr.msk.f32.vlgmr.msra.gmra.mrb[4].mxu1 %vm269_vm2, %v412_v63  ;;  %686 = vmatmul.mubr.msk.f32.vlgmr.msra.gmra.mrb[2].mxu0 %vm269_vm2, %v410_v62 }
 0x496   : > { %v690_v0 = vpop.f32.mrb[4].mxu1  ;;  %v687_v1 = vpop.f32.mrb[2].mxu0 }
 0x497   : > { %v504_v2 = vpop.f32.mrb[5].mxu1  ;;  %514 = vrot.lane.b32.xlu0 %v687_v1, %s927_s28  ;;  %v494_v3 = vpop.f32.mrb[3].mxu0 }
 0x498   : > { %518 = vrot.lane.b32.xlu1 %v504_v2, %s928_s30 }
 0x49c   : > { %522 = vrot.lane.b32.xlu1 %v690_v0, %s929_s3 }
 0x509   : > { %v515_v4 = vpop.permute.xlu0 %514 }
 0x50a   : > { %v519_v5 = vpop.permute.xlu1 %518  ;;  %v525_v6 = vsel %vm269_vm2, %v494_v3, %v515_v4 }
 0x50b   : > { %v527_v8 = vsel %vm526_vm4, %v525_v6, %v519_v5 }
 0x50e   : > { %v523_v7 = vpop.permute.xlu1 %522 }
 0x50f   : > { %v529_v9 = vsel %vm528_vm5, %v527_v8, %v523_v7 }
 0x510   : > { %530 = vst.msk [vmem:[%s173_s5] sm:$0xff] %vm179_vm1, %v529_v9 }
 0x511   : > { %856 = shalt.err (!%p853_p7)
}
 0x512   : > { %s857_s20 = scalar_lea.hbm %s1127_s24, 128  ;;  %s861_s27 = scalar_lea.hbm %s1174_s2, 256 }
 0x513   : > { %p858_p9 = scmp.ne.s32.totalorder %s1127_s24, %s857_s20  ;;  %p862_p0 = scmp.lt.u32.totalorder %s1127_s24, %s1174_s2 }
 0x514   : > { %p863_p11 = scmp.lt.u32.totalorder %s861_s27, %s857_s20  ;;  %p865_p4 = scmp.lt.u32.totalorder %s857_s20, %s1127_s24 }
 0x515   : > { %p859_p2 = pnand %p858_p9, %p1037_p12 }
 0x516   : > { %p864_p1 = por %p863_p11, %p862_p0 }
 0x517   : > { %p860_p5 = pneg %p859_p2 }
 0x518   : > { %p866_p6 = por %p865_p4, %p864_p1 }
 0x51a   : > { %p867_p8 = pnand %p866_p6, %p860_p5 }
 0x51c   : > { %870 = shalt.err (!%p867_p8)
}
 0x51d   : > { %705 = dma.vmem_to_hbm [thread:$0]  (%p1037_p12), %s1129_s6, 128, %s1127_s24, %s532_s13  }
 0x51e PF: > { %s557_s28 = sand.u32 1, %s901_s9   ;;  %p1189_p10 = scmp.ne.s32.totalorder %s1179_s16, 0 }
 0x51f   : > { %p1190_p13 = scmp.ge.s32.totalorder %s913_s12, 2  ;;  %s558_s30 = scalar_lea.sflag [#allocation4], %s557_s28 }
 0x521   : > { %p716_p3 = pnand %p1190_p13, %p1189_p10 }
 0x523   : > { %896 = dma.done.wait (!%p716_p3), %s558_s30, 128  }
 0x524   : > { %898 = vsyncadd (!%p716_p3), %s558_s30, 4294967168  ;;  %p16_p7 = scmp.ge.s32.totalorder %s1002_s21, 4   ;;  %s1191_s9 = smov %s905_s10 }
 0x525   : > { %s1192_s10 = smov %s909_s11  ;;  %s1193_s11 = smov %s1033_s8 }
 0x526   : > { %s1194_s12 = smov %s1002_s21  ;;  %18 = sbr.rel (!%p16_p7) target bundleno = 6 (0x6), region = 77 }
 0x52d   :  { %563 = vsyncpa [#allocation3], 1 }
 0x52e   :  { %565 = vsyncpa [#allocation3 + $0x1], 1 }
 0x52f   :  { %566 = vsyncpa [#allocation6], 1 }
 0x530   :  { %567 = vsyncpa [#allocation4], 1 }
 0x531   :  { %569 = vsyncpa [#allocation4 + $0x1], 1 }

</bundles_post_ra>
